<compile_context>
chip_gen: v6e
topology: v6e:2x2x1
jax: 0.10.0
libtpu: 0.0.40
codegen_flags: <defaults>
</compile_context>

<pallas_src>
import functools

import jax
import jax.numpy as jnp
import numpy as np
from jax import lax
from jax.experimental import pallas as pl
from jax.experimental.pallas import tpu as pltpu

H_OUT, W_OUT = 8, 16                       # orig_pooler.output_size = (h, w)
DST_ASPECT = float(W_OUT) / float(H_OUT)   # output_size[1] / output_size[0]
GROUP = 16                                 # boxes per grid step -> M = 128
# TODO(synk): bump GROUP to 32 on v6e/v7x (256-wide MXU) once chip-version
# detection is wired through; 16 is the safe cross-generation choice.


# --------------------------------------------------------------------------
# Pallas kernel: per-GROUP separable ROI resampling.
#   matmul 1: (G*H_OUT, H_in) @ (H_in, C*W_in)          -- fat 2-D MXU matmul
#   matmul 2: (G, H_OUT, C*W_in) @ (G, C*W_in, C*W_OUT) -- batched, Cx is the
#             pad-mask-folded block-diagonal column matrix
#   store   : one full (G, H_OUT, C*W_OUT) slab
# --------------------------------------------------------------------------
def _pool_kernel(gi_ref, ry_ref, cx_ref, feat_ref, out_ref, *, G, resident):
    del gi_ref                        # consumed only by the feature index_map
    n = pl.program_id(0)

    if resident:
        ry = ry_ref[n]                                        # (G*H_OUT, H_in)
        cx = cx_ref[pl.ds(pl.multiple_of(n * G, G), G)]       # (G, CWi, CWo)
    else:
        ry = ry_ref[0]                                        # (G*H_OUT, H_in)
        cx = cx_ref[...]                                      # (G, CWi, CWo)
    feat = feat_ref[0]                                        # (H_in, C*W_in)

    # 1) H contraction for all G boxes at once; f32 accumulation on the MXU.
    tmp = jnp.dot(ry, feat, preferred_element_type=jnp.float32)  # (G*H_OUT, CWi)

    # 2) Single contiguous f32->bf16 cast, then split the box axis out.
    tmp_b = tmp.reshape(G, H_OUT, tmp.shape[-1]).astype(jnp.bfloat16)

    # 3) Batched W contraction against the block-diagonal, pad-masked Cx.
    out = lax.dot_general(
        tmp_b, cx,
        dimension_numbers=(((2,), (1,)), ((0,), (0,))),
        preferred_element_type=jnp.float32)                   # (G, H_OUT, CWo)

    # 4) One lane-dense full-slab store.
    out_ref[...] = out


def roi_pool_grouped(feat_hcw, ry_packed, cxbd_pad, group_img, *, G):
    """feat_hcw: [B, H_in, C*W_in] bf16 (lane-dense); ry_packed:
    [NG, G*H_OUT, H_in] bf16; cxbd_pad: [N_pad, C*W_in, C*W_OUT] bf16 (mask
    folded in, block-diagonal over channels); group_img: [NG] int32."""
    B, H_in, CWi = feat_hcw.shape
    NG, GH, _ = ry_packed.shape
    N_pad, _, CWo = cxbd_pad.shape

    # Make the small per-box operands VMEM-resident when they fit a modest
    # budget; otherwise stream one group per step.
    resident = (ry_packed.size * 2 + cxbd_pad.size * 2) <= (4 << 20)
    if resident:
        ry_spec = pl.BlockSpec((NG, GH, H_in), lambda n, gi: (0, 0, 0))
        cx_spec = pl.BlockSpec((N_pad, CWi, CWo), lambda n, gi: (0, 0, 0))
        ry_blk_bytes = ry_packed.size * 2
        cx_blk_bytes = cxbd_pad.size * 2
    else:
        ry_spec = pl.BlockSpec((1, GH, H_in), lambda n, gi: (n, 0, 0))
        cx_spec = pl.BlockSpec((G, CWi, CWo), lambda n, gi: (n, 0, 0))
        ry_blk_bytes = GH * H_in * 2
        cx_blk_bytes = G * CWi * CWo * 2

    # TODO(synk): for very large feature maps (real FPN levels on v7x) add a
    # channel-tile grid axis so each buffered feature slab stays <= ~16 MiB.
    feat_spec = pl.BlockSpec((1, H_in, CWi), lambda n, gi: (gi[n], 0, 0))
    out_spec = pl.BlockSpec((G, H_OUT, CWo), lambda n, gi: (n, 0, 0))

    # Generation-aware VMEM budget (v7x: 64 MiB physical; v5e/v6e: 128 MiB).
    try:
        vmem_cap = int(pltpu.get_tpu_info().vmem_capacity_bytes)
    except Exception:
        vmem_cap = 64 << 20
    per_step = 2 * (H_in * CWi * 2 + ry_blk_bytes + cx_blk_bytes
                    + G * H_OUT * CWo * 4)
    vmem_limit = int(min(max(per_step + (8 << 20), 32 << 20),
                         int(0.75 * vmem_cap)))

    kernel = functools.partial(_pool_kernel, G=G, resident=resident)
    grid_spec = pltpu.PrefetchScalarGridSpec(
        num_scalar_prefetch=1,
        grid=(NG,),
        in_specs=[ry_spec, cx_spec, feat_spec],
        out_specs=out_spec,
    )
    return pl.pallas_call(
        kernel,
        grid_spec=grid_spec,
        out_shape=jax.ShapeDtypeStruct((N_pad, H_OUT, CWo), jnp.float32),
        compiler_params=pltpu.CompilerParams(
            dimension_semantics=("parallel",),   # image-aligned groups; v7x 2 TCs
            vmem_limit_bytes=vmem_limit,
        ),
    )(group_img, ry_packed, cxbd_pad, feat_hcw)


# --------------------------------------------------------------------------
# JAX glue: box widening, bilinear sampling matrices, mask folded into the
# block-diagonal Cx, per-image padding to GROUP-sized box groups.
# --------------------------------------------------------------------------
def _bilinear_weights(lo, hi, n_out, n_in):
    # lo/hi: [N] box edges in feature coords. One aligned bilinear sample per
    # output bin; one_hot zeroes out-of-range taps.
    i = jnp.arange(n_out, dtype=jnp.float32)
    binsz = (hi - lo)[:, None] / float(n_out)
    coord = lo[:, None] + (i[None, :] + 0.5) * binsz - 0.5
    c0 = jnp.floor(coord)
    f = coord - c0
    c0i = c0.astype(jnp.int32)
    w = (jax.nn.one_hot(c0i, n_in, dtype=jnp.float32) * (1.0 - f)[..., None]
         + jax.nn.one_hot(c0i + 1, n_in, dtype=jnp.float32) * f[..., None])
    return w                                                  # [N, n_out, n_in]


def feat_pad_v2_forward(features, boxes_list, group=GROUP):
    # features: [B, C, H_in, W_in] f32; boxes_list: list of [n_i, 4] xyxy
    B, C, H_in, W_in = features.shape
    boxes = jnp.concatenate(boxes_list, axis=0).astype(jnp.float32)      # [N, 4]
    N = boxes.shape[0]

    # ---- FeatPadV2 box widening + fractional dst padding (plain JAX glue)
    x0, y0, x1, y1 = boxes[:, 0], boxes[:, 1], boxes[:, 2], boxes[:, 3]
    w = x1 - x0
    h = y1 - y0
    ratio = DST_ASPECT / (w / h)             # NOTE: h == 0 gives inf, as in torch
    update = ratio > 1.0
    src_pad = w * (ratio - 1.0)
    x0a = jnp.where(update, x0 - 0.5 * src_pad, x0)
    x1a = jnp.where(update, x1 + 0.5 * src_pad, x1)
    dst_pad = jnp.where(update, (ratio - 1.0) / ratio * (W_OUT * 0.5), 0.0)

    # ---- separable bilinear sampling matrices
    # TODO(synk): exact detectron2 ROIAlign (sampling_ratio>1 averaging and
    # coordinate clamping) is approximated by one aligned sample per bin.
    ry = _bilinear_weights(y0, y1, H_OUT, H_in)              # [N, H_OUT, H_in]
    wx = _bilinear_weights(x0a, x1a, W_OUT, W_in)            # [N, W_OUT, W_in]
    cx = jnp.swapaxes(wx, 1, 2)                              # [N, W_in, W_OUT]

    # Fold the FeatPadV2 left/right zero-column mask into Cx.
    col = jnp.arange(W_OUT, dtype=jnp.float32)[None, :]
    keep = jnp.logical_and(col >= dst_pad[:, None], col < (W_OUT - dst_pad[:, None]))
    cxm = cx * keep[:, None, :].astype(cx.dtype)

    # Block-diagonal (over channels) masked Cx: (N, C*W_in, C*W_OUT).
    eye_c = jnp.eye(C, dtype=cxm.dtype)
    cxbd = jnp.einsum('cd,nxq->ncxdq', eye_c, cxm).reshape(N, C * W_in, C * W_OUT)

    ry_b = ry.astype(jnp.bfloat16)
    cxbd_b = cxbd.astype(jnp.bfloat16)

    # ---- pad each image's box count to a multiple of `group` so every grid
    #      step works on boxes of a single image (feature revisit + TC split).
    G = group
    ry_chunks, cx_chunks, group_img, counts = [], [], [], []
    off = 0
    for img, bx in enumerate(boxes_list):
        n_i = int(bx.shape[0])
        if n_i == 0:
            counts.append((0, 0))
            continue
        n_pad_i = -(-n_i // G) * G
        ry_i = ry_b[off:off + n_i]
        cx_i = cxbd_b[off:off + n_i]
        if n_pad_i > n_i:
            ry_i = jnp.concatenate(
                [ry_i, jnp.zeros((n_pad_i - n_i, H_OUT, H_in), ry_b.dtype)], 0)
            cx_i = jnp.concatenate(
                [cx_i, jnp.zeros((n_pad_i - n_i, C * W_in, C * W_OUT), cxbd_b.dtype)], 0)
        ry_chunks.append(ry_i)
        cx_chunks.append(cx_i)
        group_img += [img] * (n_pad_i // G)
        counts.append((n_i, n_pad_i))
        off += n_i

    ry_pad = jnp.concatenate(ry_chunks, 0)                   # (N_pad, H_OUT, H_in)
    cx_pad = jnp.concatenate(cx_chunks, 0)                   # (N_pad, CWi, CWo)
    N_pad = ry_pad.shape[0]
    NG = N_pad // G
    ry_packed = ry_pad.reshape(NG, G * H_OUT, H_in)          # (NG, G*H_OUT, H_in)
    group_img = jnp.asarray(group_img, dtype=jnp.int32)      # (NG,)

    # ---- lane-dense bf16 feature maps [B, H_in, C*W_in]
    feat_hcw = (features.transpose(0, 2, 1, 3)
                .reshape(B, H_in, C * W_in).astype(jnp.bfloat16))

    out_pad = roi_pool_grouped(feat_hcw, ry_packed, cx_pad, group_img, G=G)

    # ---- drop padded rows (image order preserved) and restore NCHW layout
    outs = []
    off = 0
    for n_i, n_pad_i in counts:
        if n_i:
            outs.append(out_pad[off:off + n_i])
        off += n_pad_i
    out = jnp.concatenate(outs, 0)                           # (N, H_OUT, C*W_OUT)
    out = out.reshape(N, H_OUT, C, W_OUT).transpose(0, 2, 1, 3)   # [N, C, H, W]
    return out


# --------------------------------------------------------------------------
# Independent float64 numpy reference (widening + sampling + masking)
# --------------------------------------------------------------------------
def _reference_forward(features, boxes_list):
    feats = np.asarray(features, dtype=np.float64)
    B, C, H_in, W_in = feats.shape
    outs = []
    for img, bx in enumerate(boxes_list):
        for x0, y0, x1, y1 in np.asarray(bx, dtype=np.float64):
            w, h = x1 - x0, y1 - y0
            ratio = DST_ASPECT / (w / h)
            pad = 0.0
            if ratio > 1.0:
                sp = w * (ratio - 1.0)
                x0, x1 = x0 - sp / 2.0, x1 + sp / 2.0
                pad = (ratio - 1.0) / ratio * W_OUT / 2.0

            def taps(c, n):
                i0 = int(np.floor(c))
                f = c - i0
                t = []
                if 0 <= i0 < n:
                    t.append((i0, 1.0 - f))
                if 0 <= i0 + 1 < n:
                    t.append((i0 + 1, f))
                return t

            box_out = np.zeros((C, H_OUT, W_OUT), dtype=np.float64)
            for oy in range(H_OUT):
                cy = y0 + (oy + 0.5) * (y1 - y0) / H_OUT - 0.5
                for ox in range(W_OUT):
                    if not (ox >= pad and ox < W_OUT - pad):
                        continue
                    cxc = x0 + (ox + 0.5) * (x1 - x0) / W_OUT - 0.5
                    v = np.zeros((C,), dtype=np.float64)
                    for iy, wy in taps(cy, H_in):
                        for ix, wxx in taps(cxc, W_in):
                            v += wy * wxx * feats[img, :, iy, ix]
                    box_out[:, oy, ox] = v
            outs.append(box_out)
    return np.stack(outs, axis=0)


if __name__ == "__main__":
    key = jax.random.PRNGKey(0)
    B, C, H_in, W_in = 2, 4, 16, 16
    features = jax.random.normal(key, (B, C, H_in, W_in), dtype=jnp.float32)

    # per-image boxes (x0, y0, x1, y1) in feature-map coordinates
    boxes0 = jnp.array([[1.0, 2.0, 13.0, 6.0],     # wide box  -> no padding
                        [2.0, 1.0, 6.0, 11.0],     # tall box  -> padded + masked
                        [0.0, 0.0, 15.0, 15.0],    # square    -> padded + masked
                        [3.0, 3.0, 12.0, 7.0]], dtype=jnp.float32)
    boxes1 = jnp.array([[4.0, 2.0, 14.0, 12.0],
                        [1.0, 5.0, 15.0, 9.0],
                        [5.0, 1.0, 9.0, 13.0],
                        [2.0, 2.0, 10.0, 6.0]], dtype=jnp.float32)

    out = feat_pad_v2_forward(features, [boxes0, boxes1])
    out = jax.block_until_ready(out)

    ref = _reference_forward(np.asarray(features),
                             [np.asarray(boxes0), np.asarray(boxes1)])
    assert out.shape == (8, C, H_OUT, W_OUT)
    assert bool(jnp.all(jnp.isfinite(out)))
    assert np.allclose(np.asarray(out), ref, atol=5e-2, rtol=5e-2)  # bf16 tolerance
    print("KERNEL_OK")
</pallas_src>

<mosaic_0001>
module attributes {stable_mosaic.version = 11 : i64} {
  func.func @_pool_kernel(%arg0: i32, %arg1: memref<2xi32, #tpu.memory_space<smem>>, %arg2: memref<2x128x16xbf16, #tpu.memory_space<vmem>>, %arg3: memref<32x64x64xbf16, #tpu.memory_space<vmem>>, %arg4: memref<1x16x64xbf16, #tpu.memory_space<vmem>>, %arg5: memref<16x8x64xf32, #tpu.memory_space<vmem>>) attributes {dimension_semantics = [#tpu.dimension_semantics<parallel>], iteration_bounds = array<i64: 2>, scalar_prefetch = 1 : i64, scratch_operands = 0 : i64, tpu.core_type = #tpu.core_type<tc>, window_params = [{pipeline_mode = #tpu.pipeline_mode<synchronous>, transform_indices = @transform_0, window_bounds = array<i64: 2, 128, 16>}, {pipeline_mode = #tpu.pipeline_mode<synchronous>, transform_indices = @transform_1, window_bounds = array<i64: 32, 64, 64>}, {transform_indices = @transform_2, window_bounds = array<i64: 1, 16, 64>}, {transform_indices = @transform_3, window_bounds = array<i64: 16, 8, 64>}]} {
    %0 = arith.index_cast %arg0 : i32 to index
    %c0 = arith.constant 0 : index
    %c0_0 = arith.constant 0 : index
    %1 = vector.load %arg2[%0, %c0, %c0_0] : memref<2x128x16xbf16, #tpu.memory_space<vmem>>, vector<1x128x16xbf16>
    %2 = vector.shape_cast %1 : vector<1x128x16xbf16> to vector<128x16xbf16>
    %c16_i32 = arith.constant 16 : i32
    %3 = arith.muli %arg0, %c16_i32 : i32
    %4 = tpu.assume_multiple %3, 16 : i32
    %5 = arith.index_cast %4 : i32 to index
    %c0_1 = arith.constant 0 : index
    %c0_2 = arith.constant 0 : index
    %6 = vector.load %arg3[%5, %c0_1, %c0_2] : memref<32x64x64xbf16, #tpu.memory_space<vmem>>, vector<16x64x64xbf16>
    %c0_3 = arith.constant 0 : index
    %c0_4 = arith.constant 0 : index
    %c0_5 = arith.constant 0 : index
    %7 = vector.load %arg4[%c0_3, %c0_4, %c0_5] : memref<1x16x64xbf16, #tpu.memory_space<vmem>>, vector<1x16x64xbf16>
    %8 = vector.shape_cast %7 : vector<1x16x64xbf16> to vector<16x64xbf16>
    %cst = arith.constant dense<0.000000e+00> : vector<128x64xf32>
    %9 = tpu.matmul %2, %8, %cst {dimension_numbers = #tpu.dot_dimension_numbers<[1], [0], [0], [1], [0, 0, 1, 1], [], []>} : vector<128x16xbf16>, vector<16x64xbf16>, vector<128x64xf32> -> vector<128x64xf32>
    %10 = vector.shape_cast %9 : vector<128x64xf32> to vector<16x8x64xf32>
    %11 = arith.truncf %10 : vector<16x8x64xf32> to vector<16x8x64xbf16>
    %cst_6 = arith.constant dense<0.000000e+00> : vector<16x8x64xf32>
    %12 = tpu.matmul %11, %6, %cst_6 {dimension_numbers = #tpu.dot_dimension_numbers<[2], [1], [1], [2], [0, 0, 0, 1, 1, 2], [0], [0]>} : vector<16x8x64xbf16>, vector<16x64x64xbf16>, vector<16x8x64xf32> -> vector<16x8x64xf32>
    %c0_7 = arith.constant 0 : index
    %c0_8 = arith.constant 0 : index
    %c0_9 = arith.constant 0 : index
    %13 = vector.load %arg5[%c0_7, %c0_8, %c0_9] : memref<16x8x64xf32, #tpu.memory_space<vmem>>, vector<16x8x64xf32>
    tpu.vector_store %arg5[%c0_7, %c0_8, %c0_9], %12 {strides = array<i32>} : memref<16x8x64xf32, #tpu.memory_space<vmem>>, vector<16x8x64xf32>,
    return
  }
  func.func @transform_0(%arg0: i32, %arg1: memref<2xi32, #tpu.memory_space<smem>>) -> (i32, i32, i32) {
    %c0_i32 = arith.constant 0 : i32
    %c0_i32_0 = arith.constant 0 : i32
    %c0_i32_1 = arith.constant 0 : i32
    %c0_i32_2 = arith.constant 0 : i32
    return %c0_i32, %c0_i32_0, %c0_i32_1 : i32, i32, i32
  }
  func.func @transform_1(%arg0: i32, %arg1: memref<2xi32, #tpu.memory_space<smem>>) -> (i32, i32, i32) {
    %c0_i32 = arith.constant 0 : i32
    %c0_i32_0 = arith.constant 0 : i32
    %c0_i32_1 = arith.constant 0 : i32
    %c0_i32_2 = arith.constant 0 : i32
    return %c0_i32, %c0_i32_0, %c0_i32_1 : i32, i32, i32
  }
  func.func @transform_2(%arg0: i32, %arg1: memref<2xi32, #tpu.memory_space<smem>>) -> (i32, i32, i32) {
    %0 = arith.index_cast %arg0 : i32 to index
    %1 = memref.load %arg1[%0] : memref<2xi32, #tpu.memory_space<smem>>
    %c0_i32 = arith.constant 0 : i32
    %c0_i32_0 = arith.constant 0 : i32
    %c0_i32_1 = arith.constant 0 : i32
    return %1, %c0_i32, %c0_i32_0 : i32, i32, i32
  }
  func.func @transform_3(%arg0: i32, %arg1: memref<2xi32, #tpu.memory_space<smem>>) -> (i32, i32, i32) {
    %c0_i32 = arith.constant 0 : i32
    %c0_i32_0 = arith.constant 0 : i32
    %c0_i32_1 = arith.constant 0 : i32
    return %arg0, %c0_i32, %c0_i32_0 : i32, i32, i32
  }
}

</mosaic_0001>

<bundles_post_ra>
// kernel: tpu_custom_call.1
= control target key start
LH: loop header
LB: loop body
LE: loop exit
PB: predicated region body
PF: predicated region fallthrough
CT: control target
= control target key end

     0   :  { %s2780_s0 = inlined_call_operand.vmem [shape: s32[2], index: 0, kind: input, shape index: {}]   ;;  %s2781_s1 = inlined_call_operand.vmem [shape: bf16[2,128,16], index: 1, kind: input, shape index: {}]   ;;  %s2782_s2 = inlined_call_operand.hbm [shape: bf16[32,64,64], index: 2, kind: input, shape index: {}]   ;;  %s2783_s3 = inlined_call_operand.vmem [shape: bf16[2,16,64], index: 3, kind: input, shape index: {}]   ;;  %s2784_s4 = inlined_call_operand.hbm [shape: f32[32,8,64], index: 4, kind: output, shape index: {}]  }
   0x1   :  { %s9_s17 = sshll.u32 %s2780_s0, 4  ;;  %s10_s17 = int_to_ptr.vmem [resolvable:$true] %s9_s17 }
   0x2   :  { %s2266_s18 = scalar_lea.vmem %s10_s17, 16  ;;  %p2271_p1 = scmp.lt.s32.totalorder %s10_s17, %s10_s17 }
   0x3   :  { %p2267_p0 = scmp.ne.s32.totalorder %s10_s17, %s2266_s18  ;;  %p2272_p2 = scmp.lt.s32.totalorder %s2266_s18, %s2266_s18 }
   0x5   :  { %p2273_p3 = por %p2272_p2, %p2271_p1 }
   0x7   :  { %p2274_p4 = pnand %p2273_p3, %p2267_p0 }
   0x9   :  { %2277 = shalt.err (!%p2274_p4)  }
   0xa   :  { %s2372_s19 = smov [#allocation3]  }
   0xb   :  { %12 = dma.vmem_to_smem %s10_s17, 16, %s2372_s19, [#allocation2] }
   0xc   :  { %2346 = dma.done.wait [#allocation2], 16 }
   0xd   :  { %2347 = vsyncadd [#allocation2], 4294967280 }
   0xe   :  { %14 = sfence }
   0xf   :  { %15 = vsyncpa [#allocation5], 0 }
  0x10   :  { %16 = vsyncpa [#allocation6], 0 }
  0x11   :  { %18 = vsyncpa [#allocation6 + $0x1], 0  ;;  %s2409_s20 = smov 0   ;;  %s2411_s21 = smov 0  }
  0x12   :  { %s2413_s0 = smov 0   ;;  %s2415_s22 = smov 0  }
  0x13 LB: > { %s2430_s23 = sadd.s32 4294967295, %s2370_s22   ;;  %s1717_s24 = sadd.s32 4294967294, %s2370_s22   ;;  %s2370_s22 = sphi %s2415_s22, %s2792_s22   ;;  %s2366_s0 = sphi %s2413_s0, %s2791_s0   ;;  %s2362_s21 = sphi %s2411_s21, %s2790_s21   ;;  %s2358_s20 = sphi %s2409_s20, %s2789_s20  }
  0x14   : > { %s2434_s25 = sadd.s32 1, %s2370_s22   ;;  %s101_s26 = sadd.s32 1, %s2366_s0 }
  0x15   : > { %s98_s27 = ssub.s32 %s2370_s22, %s2434_s25  ;;  %p111_p5 = scmp.ne.s32.totalorder %s2366_s0, %s2362_s21 }
  0x16   : > { %p99_p6 = scmp.eq.s32.totalorder %s98_s27, 0  ;;  %p112_p7 = scmp.eq.s32.totalorder %s2430_s23, 1 }
  0x17   : > { %p117_p8 = scmp.ne.s32.totalorder %s2362_s21, %s2358_s20  ;;  %p118_p9 = scmp.eq.s32.totalorder %s1717_s24, 1 }
  0x18   : > { %s2445_s28 = scalar_select %p99_p6, %s2366_s0, %s101_s26  }
  0x19   : > { %p2447_p10 = por %p112_p7, %p111_p5  ;;  %p2451_p11 = por %p118_p9, %p117_p8 }
  0x1a   : > { %p1718_p12 = scmp.ge.s32.totalorder %s2370_s22, 1  ;;  %p125_p13 = scmp.lt.s32.totalorder %s2370_s22, 3 }
  0x1b   : > { %s2786_s30 = scalar_select %p2451_p11, 1, 0 }
  0x1c   : > { %p2150_p0 = scmp.eq.s32.totalorder %s2430_s23, 0  ;;  %p2458_p1 = pnand %p1718_p12, %p125_p13 }
  0x1d   : > { %s2373_s6 = smov [#allocation4]  }
  0x1e   : > { %s140_s7 = sshll.u32 %s2373_s6, 4  ;;  %p2142_p2 = pneg %p2458_p1  ;;  %s141_s7 = int_to_ptr.vmem [resolvable:$true] %s140_s7 }
  0x1f   : > { %s2289_s8 = scalar_lea.vmem %s141_s7, 16384  ;;  %p2297_p8 = scmp.lt.s32.totalorder %s141_s7, %s141_s7 }
  0x20   : > { %p2143_p3 = pnand %p2150_p0, %p2142_p2  ;;  %p2290_p5 = scmp.ne.s32.totalorder %s141_s7, %s2289_s8 }
  0x21   : > { %p2298_p9 = scmp.lt.s32.totalorder %s2289_s8, %s2289_s8 }
  0x22   : > { %p2280_p4 = pneg %p2143_p3 }
  0x23   : > { %p2299_p11 = por %p2298_p9, %p2297_p8 }
  0x24   : > { %p2292_p6 = pnand %p2290_p5, %p2280_p4 }
  0x26   : > { %p2293_p7 = pneg %p2292_p6 }
  0x28   : > { %p2300_p12 = pnand %p2299_p11, %p2293_p7 }
  0x2a   : > { %2303 = shalt.err (!%p2300_p12)
}
  0x2b   : > { %s2374_s9 = smov 64   ;;  %s2375_s10 = smov 4  }
  0x2c   : > { %2145 = dma.hbm_to_vmem [thread:$0]  (!%p2143_p3), %s2782_s2, 16384, %s141_s7, [#allocation5], %s2374_s9, %s2374_s9, %s2375_s10  }
  0x2d   : > { %166 = sbr.rel (%p2458_p1) target bundleno = 601 (0x259), region = 32 }
  0x32   : > { %2349 = dma.done.wait (%p2150_p0), [#allocation5], 16384  }
  0x33   : > { %2351 = vsyncadd (%p2150_p0), [#allocation5], 4294950912  ;;  %s191_s13 = sld [smem:[#allocation3 + %s2430_s23]]  ;;  %s1833_s14 = sshll.u32 %s2430_s23, 6  ;;  %v2376_v0 = vmov 0.0   ;;  %vm398_vm0 = vcmask 130048  }
  0x34   : > { %1944 = vmatprep.subr.bf16.mxu1 %v2376_v0  ;;  %s2481_s17 = scalar_lea.vmem %s2781_s1, %s1833_s14  ;;  %s1835_s18 = sshll.u32 %s2430_s23, 9  ;;  %vm2377_vm1 = vmmov 0   ;;  %vm560_vm2 = vcmask 523264  }
  0x35   : > { %v2194_v1 = vld [vmem:[%s2481_s17] sm:$0xff]   ;;  %v2195_v3 = vld [vmem:[%s2481_s17 + $0x8] sm:$0xff]   ;;  %v2196_v4 = vld [vmem:[%s2481_s17 + $0x10] sm:$0xff]   ;;  %s2491_s5 = scalar_lea.vmem [#allocation4], %s1835_s18  ;;  %1952 = vmatprep.mubr.msk.bf16.mxu1 %vm2377_vm1, %v2376_v0  ;;  %s188_s6 = sand.u32 1, %s2362_s21  }
  0x36   : > { %1928 = vmatprep.mubr.msk.bf16.mxu0 %vm398_vm0, %v2194_v1  ;;  %v2202_v5 = vld [vmem:[%s2491_s5 + $0x58] sm:$0xff]   ;;  %v2205_v7 = vld [vmem:[%s2491_s5 + $0x10] sm:$0xff]   ;;  %v2207_v10 = vld [vmem:[%s2491_s5 + $0x8] sm:$0xff]   ;;  %s1723_s7 = sshll.u32 %s188_s6, 7  ;;  %s1836_s9 = sshll.u32 %s2430_s23, 11 }
  0x37   : > { %v2203_v6 = vld [vmem:[%s2491_s5 + $0x18] sm:$0xff]   ;;  %v2204_v8 = vld [vmem:[%s2491_s5 + $0x50] sm:$0xff]   ;;  %v2198_v11 = vld [vmem:[%s2481_s17 + $0x20] sm:$0xff]   ;;  %s2695_s8 = scalar_lea.vmem [#allocation7], %s1723_s7  ;;  %s2740_s14 = scalar_lea.sflag [#allocation6], %s188_s6 }
  0x38   : > { %1945 = vmatpush3.bf16.msra.mxu1 %v2203_v6  ;;  %v2197_v9 = vld [vmem:[%s2481_s17 + $0x18] sm:$0xff]   ;;  %v2206_v12 = vld [vmem:[%s2491_s5 + $0x48] sm:$0xff]   ;;  %v2200_v14 = vld [vmem:[%s2481_s17 + $0x30] sm:$0xff]   ;;  %s1639_s10 = sshll.u32 %s2695_s8, 4  ;;  %s2378_s23 = smov [#allocation7]   ;;  %s2734_s10 = int_to_ptr.vmem [resolvable:$true] %s1639_s10 }
  0x39   : > { %p192_p11 = scmp.lt.s32.totalorder %s191_s13, 1  ;;  %1946 = vmatprep.subr.bf16.mxu1 %v2376_v0  ;;  %v2199_v13 = vld [vmem:[%s2481_s17 + $0x28] sm:$0xff]   ;;  %v2201_v15 = vld [vmem:[%s2481_s17 + $0x38] sm:$0xff]   ;;  %v2208_v16 = vld [vmem:[%s2491_s5 + $0x40] sm:$0xff]   ;;  %s2304_s15 = scalar_lea.vmem %s2734_s10, 2048 }
  0x3a   : > { %v2209_v17 = vld [vmem:[%s2491_s5] sm:$0xff]   ;;  %v2212_v19 = vld [vmem:[%s2491_s5 + $0x98] sm:$0xff]   ;;  %v2214_v25 = vld [vmem:[%s2491_s5 + $0x90] sm:$0xff]   ;;  %p2305_p13 = scmp.ne.s32.totalorder %s2734_s10, %s2304_s15  ;;  %s2308_s16 = sshll.u32 %s2378_s23, 4  ;;  %s2309_s16 = int_to_ptr.vmem [resolvable:$false] %s2308_s16 }
  0x3b   : > { %s2794_s13 = smov (!%p192_p11, %s191_s13), 1  ;;  %v2210_v22 = vld [vmem:[%s2491_s5 + $0x38] sm:$0xff]   ;;  %v2211_v27 = vld [vmem:[%s2491_s5 + $0x30] sm:$0xff]   ;;  %v2216_v28 = vld [vmem:[%s2491_s5 + $0x88] sm:$0xff]   ;;  %s2310_s17 = scalar_lea.vmem %s2309_s16, 4096 }
  0x3c   : > { %s1832_s19 = sshll.u32 %s2794_s13, 3  ;;  %1947 = vmatpush3.bf16.msra.mxu1 %v2205_v7  ;;  %v2213_v30 = vld [vmem:[%s2491_s5 + $0x28] sm:$0xff]   ;;  %v2218_v31 = vld [vmem:[%s2491_s5 + $0x80] sm:$0xff]   ;;  %v2220_v35 = vld [vmem:[%s2491_s5 + $0xd8] sm:$0xff]   ;;  %s2732_s13 = scalar_lea.hbm %s2784_s4, %s1836_s9 }
  0x3d   : > { %s196_s27 = scalar_lea.vmem %s2783_s3, %s1832_s19  ;;  %1948 = vmatprep.subr.bf16.mxu1 %v2376_v0  ;;  %v2215_v33 = vld [vmem:[%s2491_s5 + $0x20] sm:$0xff]   ;;  %v2217_v36 = vld [vmem:[%s2491_s5 + $0x78] sm:$0xff]   ;;  %v2222_v38 = vld [vmem:[%s2491_s5 + $0xd0] sm:$0xff]   ;;  %p2306_p0 = pnand %p2305_p13, %p2447_p10 }
  0x3e   : > { %v2193_v2 = vld [vmem:[%s196_s27] sm:$0xff]   ;;  %v2219_v39 = vld [vmem:[%s2491_s5 + $0x70] sm:$0xff]   ;;  %v2224_v40 = vld [vmem:[%s2491_s5 + $0xc8] sm:$0xff]   ;;  %p2311_p2 = scmp.lt.s32.totalorder %s2734_s10, %s2309_s16  ;;  %p2312_p3 = scmp.lt.s32.totalorder %s2310_s17, %s2304_s15 }
  0x3f   : > { %1926 = vmatprep.subr.bf16.mxu0 %v2193_v2  ;;  %v2221_v41 = vld [vmem:[%s2491_s5 + $0x68] sm:$0xff]   ;;  %v2226_v42 = vld [vmem:[%s2491_s5 + $0xc0] sm:$0xff]   ;;  %v2228_v45 = vld [vmem:[%s2491_s5 + $0x118] sm:$0xff]   ;;  %p2307_p1 = pneg %p2306_p0 }
  0x40   : > { %1927 = vmatpush3.bf16.msra.mxu0 %v2193_v2  ;;  %1949 = vmatpush3.bf16.msra.mxu1 %v2207_v10  ;;  %v2223_v43 = vld [vmem:[%s2491_s5 + $0x60] sm:$0xff]   ;;  %v2225_v46 = vld [vmem:[%s2491_s5 + $0xb8] sm:$0xff]   ;;  %v2230_v49 = vld [vmem:[%s2491_s5 + $0x110] sm:$0xff]   ;;  %p2313_p4 = por %p2312_p3, %p2311_p2 }
  0x41   : > { %1968 = vmatprep.subr.bf16.mxu0 %v2376_v0  ;;  %1950 = vmatprep.subr.bf16.mxu1 %v2376_v0  ;;  %v2227_v50 = vld [vmem:[%s2491_s5 + $0xb0] sm:$0xff]   ;;  %v2232_v52 = vld [vmem:[%s2491_s5 + $0x108] sm:$0xff]   ;;  %v2234_v55 = vld [vmem:[%s2491_s5 + $0x100] sm:$0xff]  }
  0x42   : > { %v2229_v54 = vld [vmem:[%s2491_s5 + $0xa8] sm:$0xff]   ;;  %v2231_v57 = vld [vmem:[%s2491_s5 + $0xa0] sm:$0xff]   ;;  %v2236_v59 = vld [vmem:[%s2491_s5 + $0x158] sm:$0xff]   ;;  %p2314_p5 = pnand %p2313_p4, %p2307_p1 }
  0x43   : > { %1929 = vmatmul.mubr.msk.bf16.vlgmr.msra.gmra.mxu0 %vm398_vm0, %v2195_v3  ;;  %v2233_v60 = vld [vmem:[%s2491_s5 + $0xf8] sm:$0xff]   ;;  %v2238_v62 = vld [vmem:[%s2491_s5 + $0x150] sm:$0xff]   ;;  %v2240_v1 = vld [vmem:[%s2491_s5 + $0x148] sm:$0xff]  }
  0x44   : > { %1932 = vmatprep.mubr.msk.bf16.mxu0 %vm398_vm0, %v2196_v4  ;;  %1969 = vmatpush3.bf16.msra.mxu0 %v2202_v5  ;;  %v2235_v63 = vld [vmem:[%s2491_s5 + $0xf0] sm:$0xff]   ;;  %v2237_v2 = vld [vmem:[%s2491_s5 + $0xe8] sm:$0xff]   ;;  %v2242_v3 = vld [vmem:[%s2491_s5 + $0x140] sm:$0xff]  }
  0x45   : > { %1970 = vmatprep.subr.bf16.mxu0 %v2376_v0  ;;  %1951 = vmatpush3.bf16.msra.mxu1 %v2209_v17  ;;  %v2239_v4 = vld [vmem:[%s2491_s5 + $0xe0] sm:$0xff]   ;;  %v2244_v6 = vld [vmem:[%s2491_s5 + $0x198] sm:$0xff]   ;;  %v2246_v10 = vld [vmem:[%s2491_s5 + $0x190] sm:$0xff]  }
  0x46   : > { %1956 = vmatprep.subr.bf16.mxu1 %v2376_v0  ;;  %v2241_v7 = vld [vmem:[%s2491_s5 + $0x138] sm:$0xff]  }
  0x48   : > { %1971 = vmatpush3.bf16.msra.mxu0 %v2204_v8 }
  0x49   : > { %1972 = vmatprep.subr.bf16.mxu0 %v2376_v0 }
  0x4b   : > { %1933 = vmatmul.mubr.msk.bf16.gmra.mxu0 %vm398_vm0, %v2197_v9 }
  0x4c   : > { %1936 = vmatprep.mubr.msk.bf16.mxu0 %vm398_vm0, %v2198_v11  ;;  %1973 = vmatpush3.bf16.msra.mxu0 %v2206_v12  ;;  %v2243_v11 = vld [vmem:[%s2491_s5 + $0x130] sm:$0xff]  }
  0x4d   : > { %1974 = vmatprep.subr.bf16.mxu0 %v2376_v0 }
  0x50   : > { %1975 = vmatpush3.bf16.msra.mxu0 %v2208_v16  ;;  %v2250_v16 = vld [vmem:[%s2491_s5 + $0x180] sm:$0xff]  }
  0x51   : > { %1992 = vmatprep.subr.bf16.mxu0 %v2376_v0 }
  0x53   : > { %1937 = vmatmul.mubr.msk.bf16.gmra.mxu0 %vm398_vm0, %v2199_v13  ;;  %v2248_v13 = vld [vmem:[%s2491_s5 + $0x188] sm:$0xff]  }
  0x54   : > { %1940 = vmatprep.mubr.msk.bf16.mxu0 %vm398_vm0, %v2200_v14 }
  0x5b   : > { %1941 = vmatmul.mubr.msk.bf16.gmra.mxu0 %vm398_vm0, %v2201_v15  ;;  %v2245_v15 = vld [vmem:[%s2491_s5 + $0x128] sm:$0xff]  }
  0x5c   : > { %1976 = vmatprep.mubr.msk.bf16.mxu0 %vm2377_vm1, %v2376_v0 }
 0x103   : > { %v1930_v18 = vpop.f32.mrf.mxu0 }
 0x104   : > { %v522_v20 = vpack.c.bf16 %v1930_v18, %v1930_v18  ;;  %v2247_v18 = vld [vmem:[%s2491_s5 + $0x120] sm:$0xff]  }
 0x105   : > { %v457_v21 = vpop.f32.mrf.mxu0 }
 0x106   : > { %v520_v23 = vpack.c.bf16 %v457_v21, %v457_v21  ;;  %1977 = vmatmul.mubr.msk.bf16.vlgmr.msra.gmra.mxu0 %vm560_vm2, %v522_v20  ;;  %v2252_v20 = vld [vmem:[%s2491_s5 + $0x1d8] sm:$0xff]  }
 0x107   : > { %v2529_v24 = vpop.f32.mrf.mxu0  ;;  %1993 = vmatpush3.bf16.msra.mxu0 %v2212_v19  ;;  %2000 = vmatprep.mubr.msk.bf16.mxu0 %vm2377_vm1, %v2376_v0  ;;  %v2249_v21 = vld [vmem:[%s2491_s5 + $0x178] sm:$0xff]  }
 0x108   : > { %1953 = vmatmul.mubr.msk.bf16.vlgmr.msra.gmra.mxu1 %vm560_vm2, %v520_v23  ;;  %1994 = vmatprep.subr.bf16.mxu0 %v2376_v0  ;;  %v523_v48 = vpack.c.bf16 %v2529_v24, %v2529_v24  ;;  %v2254_v23 = vld [vmem:[%s2491_s5 + $0x1d0] sm:$0xff]  }
 0x109   : > { %1957 = vmatpush3.bf16.msra.mxu1 %v2210_v22  ;;  %v460_v26 = vpop.f32.mrf.mxu0  ;;  %1964 = vmatprep.mubr.msk.bf16.mxu1 %vm2377_vm1, %v2376_v0  ;;  %v2251_v24 = vld [vmem:[%s2491_s5 + $0x170] sm:$0xff]  }
 0x10a   : > { %1958 = vmatprep.subr.bf16.mxu1 %v2376_v0  ;;  %v521_v37 = vpack.c.bf16 %v460_v26, %v460_v26  ;;  %v2253_v26 = vld [vmem:[%s2491_s5 + $0x168] sm:$0xff]  }
 0x10b   : > { %1995 = vmatpush3.bf16.msra.mxu0 %v2214_v25  ;;  %v1934_v29 = vpop.f32.mrf.mxu0  ;;  %v2256_v25 = vld [vmem:[%s2491_s5 + $0x1c8] sm:$0xff]  }
 0x10c   : > { %1996 = vmatprep.subr.bf16.mxu0 %v2376_v0  ;;  %v526_v44 = vpack.c.bf16 %v1934_v29, %v1934_v29 }
 0x10d   : > { %1959 = vmatpush3.bf16.msra.mxu1 %v2211_v27  ;;  %v473_v32 = vpop.f32.mrf.mxu0  ;;  %v2258_v27 = vld [vmem:[%s2491_s5 + $0x1c0] sm:$0xff]  }
 0x10e   : > { %1960 = vmatprep.subr.bf16.mxu1 %v2376_v0  ;;  %v524_v34 = vpack.c.bf16 %v473_v32, %v473_v32  ;;  %v2259_v32 = vld [vmem:[%s2491_s5 + $0x1b0] sm:$0xff]  }
 0x10f   : > { %1997 = vmatpush3.bf16.msra.mxu0 %v2216_v28  ;;  %v2573_v47 = vpop.f32.mrf.mxu0  ;;  %v2255_v28 = vld [vmem:[%s2491_s5 + $0x160] sm:$0xff]  }
 0x110   : > { %1998 = vmatprep.subr.bf16.mxu0 %v2376_v0  ;;  %v527_v9 = vpack.c.bf16 %v2573_v47, %v2573_v47 }
 0x111   : > { %1961 = vmatpush3.bf16.msra.mxu1 %v2213_v30  ;;  %v476_v51 = vpop.f32.mrf.mxu0  ;;  %v2257_v30 = vld [vmem:[%s2491_s5 + $0x1b8] sm:$0xff]  }
 0x112   : > { %1962 = vmatprep.subr.bf16.mxu1 %v2376_v0  ;;  %v525_v61 = vpack.c.bf16 %v476_v51, %v476_v51 }
 0x113   : > { %1999 = vmatpush3.bf16.msra.mxu0 %v2218_v31  ;;  %v1938_v53 = vpop.f32.mrf.mxu0 }
 0x114   : > { %2016 = vmatprep.subr.bf16.mxu0 %v2376_v0  ;;  %v530_v5 = vpack.c.bf16 %v1938_v53, %v1938_v53 }
 0x115   : > { %1963 = vmatpush3.bf16.msra.mxu1 %v2215_v33  ;;  %v489_v56 = vpop.f32.mrf.mxu0  ;;  %v2260_v33 = vld [vmem:[%s2491_s5 + $0x1a8] sm:$0xff]  }
 0x116   : > { %1980 = vmatprep.subr.bf16.mxu1 %v2376_v0  ;;  %2001 = vmatmul.mubr.msk.bf16.vlgmr.msra.gmra.mxu0 %vm560_vm2, %v524_v34  ;;  %v528_v58 = vpack.c.bf16 %v489_v56, %v489_v56 }
 0x117   : > { %2017 = vmatpush3.bf16.msra.mxu0 %v2220_v35  ;;  %2024 = vmatprep.mubr.msk.bf16.mxu0 %vm2377_vm1, %v2376_v0  ;;  %v2621_v8 = vpop.f32.mrf.mxu0  ;;  %v2261_v35 = vld [vmem:[%s2491_s5 + $0x1a0] sm:$0xff]  }
 0x118   : > { %1965 = vmatmul.mubr.msk.bf16.vlgmr.msra.gmra.mxu1 %vm560_vm2, %v521_v37  ;;  %2018 = vmatprep.subr.bf16.mxu0 %v2376_v0  ;;  %v531_v31 = vpack.c.bf16 %v2621_v8, %v2621_v8  ;;  %v2262_v37 = vld [vmem:[%s2491_s5 + $0x1f8] sm:$0xff]  }
 0x119   : > { %1981 = vmatpush3.bf16.msra.mxu1 %v2217_v36  ;;  %1988 = vmatprep.mubr.msk.bf16.mxu1 %vm2377_vm1, %v2376_v0  ;;  %v492_v12 = vpop.f32.mrf.mxu0 }
 0x11a   : > { %1982 = vmatprep.subr.bf16.mxu1 %v2376_v0  ;;  %v529_v22 = vpack.c.bf16 %v492_v12, %v492_v12 }
 0x11b   : > { %2019 = vmatpush3.bf16.msra.mxu0 %v2222_v38  ;;  %v1942_v14 = vpop.f32.mrf.mxu0 }
 0x11c   : > { %2020 = vmatprep.subr.bf16.mxu0 %v2376_v0  ;;  %v534_v29 = vpack.c.bf16 %v1942_v14, %v1942_v14 }
 0x11d   : > { %1983 = vmatpush3.bf16.msra.mxu1 %v2219_v39  ;;  %v505_v17 = vpop.f32.mrf.mxu0  ;;  %v2263_v39 = vld [vmem:[%s2491_s5 + $0x1f0] sm:$0xff]  }
 0x11e   : > { %1984 = vmatprep.subr.bf16.mxu1 %v2376_v0  ;;  %v532_v19 = vpack.c.bf16 %v505_v17, %v505_v17 }
 0x11f   : > { %2021 = vmatpush3.bf16.msra.mxu0 %v2224_v40  ;;  %v1943_v34 = vpop.f32.mrf.mxu0  ;;  %v2264_v40 = vld [vmem:[%s2491_s5 + $0x1e8] sm:$0xff]  }
 0x120   : > { %2022 = vmatprep.subr.bf16.mxu0 %v2376_v0 }
 0x121   : > { %1985 = vmatpush3.bf16.msra.mxu1 %v2221_v41  ;;  %v508_v36 = vpop.f32.mrf.mxu0  ;;  %v2265_v41 = vld [vmem:[%s2491_s5 + $0x1e0] sm:$0xff]  }
 0x122   : > { %1986 = vmatprep.subr.bf16.mxu1 %v2376_v0  ;;  %v533_v38 = vpack.c.bf16 %v508_v36, %v508_v36 }
 0x123   : > { %2023 = vmatpush3.bf16.msra.mxu0 %v2226_v42  ;;  %v535_v42 = vpack.c.bf16 %v1943_v34, %v1943_v34 }
 0x124   : > { %2040 = vmatprep.subr.bf16.mxu0 %v2376_v0 }
 0x125   : > { %1987 = vmatpush3.bf16.msra.mxu1 %v2223_v43 }
 0x126   : > { %2004 = vmatprep.subr.bf16.mxu1 %v2376_v0  ;;  %2025 = vmatmul.mubr.msk.bf16.vlgmr.msra.gmra.mxu0 %vm560_vm2, %v526_v44 }
 0x127   : > { %2041 = vmatpush3.bf16.msra.mxu0 %v2228_v45  ;;  %2048 = vmatprep.mubr.msk.bf16.mxu0 %vm2377_vm1, %v2376_v0 }
 0x128   : > { %1989 = vmatmul.mubr.msk.bf16.vlgmr.msra.gmra.mxu1 %vm560_vm2, %v523_v48  ;;  %2042 = vmatprep.subr.bf16.mxu0 %v2376_v0 }
 0x129   : > { %2005 = vmatpush3.bf16.msra.mxu1 %v2225_v46  ;;  %2012 = vmatprep.mubr.msk.bf16.mxu1 %vm2377_vm1, %v2376_v0 }
 0x12a   : > { %2006 = vmatprep.subr.bf16.mxu1 %v2376_v0 }
 0x12b   : > { %2043 = vmatpush3.bf16.msra.mxu0 %v2230_v49 }
 0x12c   : > { %2044 = vmatprep.subr.bf16.mxu0 %v2376_v0 }
 0x12d   : > { %2007 = vmatpush3.bf16.msra.mxu1 %v2227_v50 }
 0x12e   : > { %2008 = vmatprep.subr.bf16.mxu1 %v2376_v0 }
 0x12f   : > { %2045 = vmatpush3.bf16.msra.mxu0 %v2232_v52 }
 0x130   : > { %2046 = vmatprep.subr.bf16.mxu0 %v2376_v0 }
 0x131   : > { %2009 = vmatpush3.bf16.msra.mxu1 %v2229_v54 }
 0x132   : > { %2010 = vmatprep.subr.bf16.mxu1 %v2376_v0 }
 0x133   : > { %2047 = vmatpush3.bf16.msra.mxu0 %v2234_v55 }
 0x134   : > { %2064 = vmatprep.subr.bf16.mxu0 %v2376_v0 }
 0x135   : > { %2011 = vmatpush3.bf16.msra.mxu1 %v2231_v57 }
 0x136   : > { %2028 = vmatprep.subr.bf16.mxu1 %v2376_v0  ;;  %2049 = vmatmul.mubr.msk.bf16.vlgmr.msra.gmra.mxu0 %vm560_vm2, %v528_v58 }
 0x137   : > { %2065 = vmatpush3.bf16.msra.mxu0 %v2236_v59  ;;  %2072 = vmatprep.mubr.msk.bf16.mxu0 %vm2377_vm1, %v2376_v0 }
 0x138   : > { %2013 = vmatmul.mubr.msk.bf16.vlgmr.msra.gmra.mxu1 %vm560_vm2, %v525_v61  ;;  %2066 = vmatprep.subr.bf16.mxu0 %v2376_v0 }
 0x139   : > { %2029 = vmatpush3.bf16.msra.mxu1 %v2233_v60  ;;  %2036 = vmatprep.mubr.msk.bf16.mxu1 %vm2377_vm1, %v2376_v0 }
 0x13a   : > { %2030 = vmatprep.subr.bf16.mxu1 %v2376_v0 }
 0x13b   : > { %2067 = vmatpush3.bf16.msra.mxu0 %v2238_v62 }
 0x13c   : > { %2068 = vmatprep.subr.bf16.mxu0 %v2376_v0 }
 0x13d   : > { %2031 = vmatpush3.bf16.msra.mxu1 %v2235_v63 }
 0x13e   : > { %2032 = vmatprep.subr.bf16.mxu1 %v2376_v0 }
 0x13f   : > { %2069 = vmatpush3.bf16.msra.mxu0 %v2240_v1 }
 0x140   : > { %2070 = vmatprep.subr.bf16.mxu0 %v2376_v0 }
 0x141   : > { %2033 = vmatpush3.bf16.msra.mxu1 %v2237_v2 }
 0x142   : > { %2034 = vmatprep.subr.bf16.mxu1 %v2376_v0 }
 0x143   : > { %2071 = vmatpush3.bf16.msra.mxu0 %v2242_v3 }
 0x144   : > { %2088 = vmatprep.subr.bf16.mxu0 %v2376_v0 }
 0x145   : > { %2035 = vmatpush3.bf16.msra.mxu1 %v2239_v4 }
 0x146   : > { %2052 = vmatprep.subr.bf16.mxu1 %v2376_v0  ;;  %2073 = vmatmul.mubr.msk.bf16.vlgmr.msra.gmra.mxu0 %vm560_vm2, %v530_v5 }
 0x147   : > { %2089 = vmatpush3.bf16.msra.mxu0 %v2244_v6  ;;  %2096 = vmatprep.mubr.msk.bf16.mxu0 %vm2377_vm1, %v2376_v0 }
 0x148   : > { %2037 = vmatmul.mubr.msk.bf16.vlgmr.msra.gmra.mxu1 %vm560_vm2, %v527_v9  ;;  %2090 = vmatprep.subr.bf16.mxu0 %v2376_v0 }
 0x149   : > { %2053 = vmatpush3.bf16.msra.mxu1 %v2241_v7  ;;  %2060 = vmatprep.mubr.msk.bf16.mxu1 %vm2377_vm1, %v2376_v0 }
 0x14a   : > { %2054 = vmatprep.subr.bf16.mxu1 %v2376_v0 }
 0x14b   : > { %2091 = vmatpush3.bf16.msra.mxu0 %v2246_v10 }
 0x14c   : > { %2092 = vmatprep.subr.bf16.mxu0 %v2376_v0 }
 0x14d   : > { %2055 = vmatpush3.bf16.msra.mxu1 %v2243_v11 }
 0x14e   : > { %2056 = vmatprep.subr.bf16.mxu1 %v2376_v0 }
 0x14f   : > { %2093 = vmatpush3.bf16.msra.mxu0 %v2248_v13 }
 0x150   : > { %2094 = vmatprep.subr.bf16.mxu0 %v2376_v0 }
 0x151   : > { %2057 = vmatpush3.bf16.msra.mxu1 %v2245_v15 }
 0x152   : > { %2058 = vmatprep.subr.bf16.mxu1 %v2376_v0 }
 0x153   : > { %2095 = vmatpush3.bf16.msra.mxu0 %v2250_v16 }
 0x154   : > { %2112 = vmatprep.subr.bf16.mxu0 %v2376_v0 }
 0x155   : > { %2059 = vmatpush3.bf16.msra.mxu1 %v2247_v18 }
 0x156   : > { %2076 = vmatprep.subr.bf16.mxu1 %v2376_v0  ;;  %2097 = vmatmul.mubr.msk.bf16.vlgmr.msra.gmra.mxu0 %vm560_vm2, %v532_v19 }
 0x157   : > { %2113 = vmatpush3.bf16.msra.mxu0 %v2252_v20  ;;  %2120 = vmatprep.mubr.msk.bf16.mxu0 %vm2377_vm1, %v2376_v0 }
 0x158   : > { %2061 = vmatmul.mubr.msk.bf16.vlgmr.msra.gmra.mxu1 %vm560_vm2, %v529_v22  ;;  %2114 = vmatprep.subr.bf16.mxu0 %v2376_v0 }
 0x159   : > { %2077 = vmatpush3.bf16.msra.mxu1 %v2249_v21  ;;  %2084 = vmatprep.mubr.msk.bf16.mxu1 %vm2377_vm1, %v2376_v0 }
 0x15a   : > { %2078 = vmatprep.subr.bf16.mxu1 %v2376_v0 }
 0x15b   : > { %2115 = vmatpush3.bf16.msra.mxu0 %v2254_v23 }
 0x15c   : > { %2116 = vmatprep.subr.bf16.mxu0 %v2376_v0 }
 0x15d   : > { %2079 = vmatpush3.bf16.msra.mxu1 %v2251_v24 }
 0x15e   : > { %2080 = vmatprep.subr.bf16.mxu1 %v2376_v0 }
 0x15f   : > { %2117 = vmatpush3.bf16.msra.mxu0 %v2256_v25 }
 0x160   : > { %2118 = vmatprep.subr.bf16.mxu0 %v2376_v0 }
 0x161   : > { %2081 = vmatpush3.bf16.msra.mxu1 %v2253_v26 }
 0x162   : > { %2082 = vmatprep.subr.bf16.mxu1 %v2376_v0 }
 0x163   : > { %2119 = vmatpush3.bf16.msra.mxu0 %v2258_v27 }
 0x165   : > { %2083 = vmatpush3.bf16.msra.mxu1 %v2255_v28 }
 0x166   : > { %2100 = vmatprep.subr.bf16.mxu1 %v2376_v0  ;;  %2121 = vmatmul.mubr.msk.bf16.vlgmr.msra.gmra.mxu0 %vm560_vm2, %v534_v29 }
 0x168   : > { %2085 = vmatmul.mubr.msk.bf16.vlgmr.msra.gmra.mxu1 %vm560_vm2, %v531_v31 }
 0x169   : > { %2101 = vmatpush3.bf16.msra.mxu1 %v2257_v30  ;;  %2108 = vmatprep.mubr.msk.bf16.mxu1 %vm2377_vm1, %v2376_v0 }
 0x16a   : > { %2102 = vmatprep.subr.bf16.mxu1 %v2376_v0 }
 0x16d   : > { %2103 = vmatpush3.bf16.msra.mxu1 %v2259_v32 }
 0x16e   : > { %2104 = vmatprep.subr.bf16.mxu1 %v2376_v0 }
 0x171   : > { %2105 = vmatpush3.bf16.msra.mxu1 %v2260_v33 }
 0x172   : > { %2106 = vmatprep.subr.bf16.mxu1 %v2376_v0 }
 0x175   : > { %2107 = vmatpush3.bf16.msra.mxu1 %v2261_v35 }
 0x176   : > { %2124 = vmatprep.subr.bf16.mxu1 %v2376_v0 }
 0x178   : > { %2109 = vmatmul.mubr.msk.bf16.vlgmr.msra.gmra.mxu1 %vm560_vm2, %v533_v38 }
 0x179   : > { %2125 = vmatpush3.bf16.msra.mxu1 %v2262_v37  ;;  %2132 = vmatprep.mubr.msk.bf16.mxu1 %vm2377_vm1, %v2376_v0 }
 0x17a   : > { %2126 = vmatprep.subr.bf16.mxu1 %v2376_v0 }
 0x17d   : > { %2127 = vmatpush3.bf16.msra.mxu1 %v2263_v39 }
 0x17e   : > { %2128 = vmatprep.subr.bf16.mxu1 %v2376_v0 }
 0x181   : > { %2129 = vmatpush3.bf16.msra.mxu1 %v2264_v40 }
 0x182   : > { %2130 = vmatprep.subr.bf16.mxu1 %v2376_v0 }
 0x185   : > { %2131 = vmatpush3.bf16.msra.mxu1 %v2265_v41 }
 0x188   : > { %2133 = vmatmul.mubr.msk.bf16.vlgmr.msra.gmra.mxu1 %vm560_vm2, %v535_v42 }
 0x1c6   : > { %v732_v43 = vpop.f32.mrf.mxu0 }
 0x1c7   : > { %1611 = vst.msk [vmem:[%s2695_s8 + $0x10] sm:$0xff] %vm560_vm2, %v732_v43 }
 0x1c8   : > { %v598_v44 = vpop.f32.mrf.mxu1  ;;  %v1978_v45 = vpop.f32.mrf.mxu0 }
 0x1c9   : > { %1609 = vst.msk [vmem:[%s2695_s8] sm:$0xff] %vm560_vm2, %v598_v44 }
 0x1ca   : > { %v1954_v0 = vpop.f32.mrf.mxu1  ;;  %v735_v46 = vpop.f32.mrf.mxu0 }
 0x1cc   : > { %v601_v47 = vpop.f32.mrf.mxu1  ;;  %v1979_v48 = vpop.f32.mrf.mxu0 }
 0x1ce   : > { %v1955_v49 = vpop.f32.mrf.mxu1 }
 0x1d6   : > { %v866_v50 = vpop.f32.mrf.mxu0 }
 0x1d7   : > { %1613 = vst.msk [vmem:[%s2695_s8 + $0x20] sm:$0xff] %vm560_vm2, %v866_v50 }
 0x1d8   : > { %v665_v51 = vpop.f32.mrf.mxu1  ;;  %v2002_v52 = vpop.f32.mrf.mxu0 }
 0x1d9   : > { %1610 = vst.msk [vmem:[%s2695_s8 + $0x8] sm:$0xff] %vm560_vm2, %v665_v51 }
 0x1da   : > { %v1966_v53 = vpop.f32.mrf.mxu1  ;;  %v869_v54 = vpop.f32.mrf.mxu0 }
 0x1dc   : > { %v668_v55 = vpop.f32.mrf.mxu1  ;;  %v2003_v56 = vpop.f32.mrf.mxu0 }
 0x1de   : > { %v1967_v57 = vpop.f32.mrf.mxu1 }
 0x1e6   : > { %v1000_v58 = vpop.f32.mrf.mxu0 }
 0x1e7   : > { %1615 = vst.msk [vmem:[%s2695_s8 + $0x30] sm:$0xff] %vm560_vm2, %v1000_v58 }
 0x1e8   : > { %v799_v59 = vpop.f32.mrf.mxu1  ;;  %v2026_v60 = vpop.f32.mrf.mxu0 }
 0x1e9   : > { %1612 = vst.msk [vmem:[%s2695_s8 + $0x18] sm:$0xff] %vm560_vm2, %v799_v59 }
 0x1ea   : > { %v1990_v61 = vpop.f32.mrf.mxu1  ;;  %v1003_v62 = vpop.f32.mrf.mxu0 }
 0x1ec   : > { %v802_v63 = vpop.f32.mrf.mxu1  ;;  %v2027_v1 = vpop.f32.mrf.mxu0 }
 0x1ee   : > { %v1991_v2 = vpop.f32.mrf.mxu1 }
 0x1f6   : > { %v1134_v3 = vpop.f32.mrf.mxu0 }
 0x1f7   : > { %1617 = vst.msk [vmem:[%s2695_s8 + $0x40] sm:$0xff] %vm560_vm2, %v1134_v3 }
 0x1f8   : > { %v933_v4 = vpop.f32.mrf.mxu1  ;;  %v2050_v5 = vpop.f32.mrf.mxu0 }
 0x1f9   : > { %1614 = vst.msk [vmem:[%s2695_s8 + $0x28] sm:$0xff] %vm560_vm2, %v933_v4 }
 0x1fa   : > { %v2014_v6 = vpop.f32.mrf.mxu1  ;;  %v1137_v7 = vpop.f32.mrf.mxu0 }
 0x1fc   : > { %v936_v8 = vpop.f32.mrf.mxu1  ;;  %v2051_v9 = vpop.f32.mrf.mxu0 }
 0x1fe   : > { %v2015_v10 = vpop.f32.mrf.mxu1 }
 0x206   : > { %v1268_v11 = vpop.f32.mrf.mxu0 }
 0x207   : > { %1619 = vst.msk [vmem:[%s2695_s8 + $0x50] sm:$0xff] %vm560_vm2, %v1268_v11 }
 0x208   : > { %v1067_v12 = vpop.f32.mrf.mxu1  ;;  %v2074_v13 = vpop.f32.mrf.mxu0 }
 0x209   : > { %1616 = vst.msk [vmem:[%s2695_s8 + $0x38] sm:$0xff] %vm560_vm2, %v1067_v12 }
 0x20a   : > { %v2038_v14 = vpop.f32.mrf.mxu1  ;;  %v1271_v15 = vpop.f32.mrf.mxu0 }
 0x20c   : > { %v1070_v16 = vpop.f32.mrf.mxu1  ;;  %v2075_v17 = vpop.f32.mrf.mxu0 }
 0x20e   : > { %v2039_v18 = vpop.f32.mrf.mxu1 }
 0x216   : > { %v1402_v19 = vpop.f32.mrf.mxu0 }
 0x217   : > { %1621 = vst.msk [vmem:[%s2695_s8 + $0x60] sm:$0xff] %vm560_vm2, %v1402_v19 }
 0x218   : > { %v1201_v20 = vpop.f32.mrf.mxu1  ;;  %v2098_v21 = vpop.f32.mrf.mxu0 }
 0x219   : > { %1618 = vst.msk [vmem:[%s2695_s8 + $0x48] sm:$0xff] %vm560_vm2, %v1201_v20 }
 0x21a   : > { %v2062_v22 = vpop.f32.mrf.mxu1  ;;  %v1405_v23 = vpop.f32.mrf.mxu0 }
 0x21c   : > { %v1204_v24 = vpop.f32.mrf.mxu1  ;;  %v2099_v25 = vpop.f32.mrf.mxu0 }
 0x21e   : > { %v2063_v26 = vpop.f32.mrf.mxu1 }
 0x226   : > { %v1536_v27 = vpop.f32.mrf.mxu0 }
 0x227   : > { %1623 = vst.msk [vmem:[%s2695_s8 + $0x70] sm:$0xff] %vm560_vm2, %v1536_v27 }
 0x228   : > { %v1335_v28 = vpop.f32.mrf.mxu1  ;;  %v2122_v29 = vpop.f32.mrf.mxu0 }
 0x229   : > { %1620 = vst.msk [vmem:[%s2695_s8 + $0x58] sm:$0xff] %vm560_vm2, %v1335_v28 }
 0x22a   : > { %v2086_v30 = vpop.f32.mrf.mxu1  ;;  %v1539_v31 = vpop.f32.mrf.mxu0 }
 0x22c   : > { %v1338_v32 = vpop.f32.mrf.mxu1  ;;  %v2123_v33 = vpop.f32.mrf.mxu0 }
 0x22e   : > { %v2087_v34 = vpop.f32.mrf.mxu1 }
 0x238   : > { %v1469_v35 = vpop.f32.mrf.mxu1 }
 0x239   : > { %1622 = vst.msk [vmem:[%s2695_s8 + $0x68] sm:$0xff] %vm560_vm2, %v1469_v35 }
 0x23a   : > { %v2110_v36 = vpop.f32.mrf.mxu1 }
 0x23c   : > { %v1472_v37 = vpop.f32.mrf.mxu1 }
 0x23e   : > { %v2111_v38 = vpop.f32.mrf.mxu1 }
 0x248   : > { %v1603_v39 = vpop.f32.mrf.mxu1 }
 0x249   : > { %1624 = vst.msk [vmem:[%s2695_s8 + $0x78] sm:$0xff] %vm560_vm2, %v1603_v39 }
 0x24a   : > { %v2134_v40 = vpop.f32.mrf.mxu1 }
 0x24b   : > { %2317 = shalt.err (!%p2314_p5)
}
 0x24c   : > { %s2318_s18 = scalar_lea.hbm %s2732_s13, 2048  ;;  %s2322_s26 = scalar_lea.hbm %s2784_s4, 4096 }
 0x24d   : > { %p2319_p6 = scmp.ne.s32.totalorder %s2732_s13, %s2318_s18  ;;  %p2323_p9 = scmp.lt.s32.totalorder %s2732_s13, %s2784_s4 }
 0x24e   : > { %p2324_p12 = scmp.lt.s32.totalorder %s2322_s26, %s2318_s18 }
 0x24f   : > { %p2320_p7 = pnand %p2319_p6, %p2447_p10 }
 0x250   : > { %p2325_p11 = por %p2324_p12, %p2323_p9 }
 0x251   : > { %p2321_p8 = pneg %p2320_p7 }
 0x253   : > { %p2326_p13 = pnand %p2325_p11, %p2321_p8 }
 0x255   : > { %2329 = shalt.err (!%p2326_p13)
}
 0x256   : > { %s2379_s6 = smov 128   ;;  %s2380_s7 = smov 8   ;;  %v1606_v41 = vpop.f32.mrf.mxu1 }
 0x257   : > { %2140 = dma.vmem_to_hbm [thread:$0]  (%p2447_p10), %s2734_s10, 2048, %s2732_s13, %s2740_s14, %s2379_s6, %s2379_s6, %s2380_s7  }
 0x258   : > { %v2135_v42 = vpop.f32.mrf.mxu1 }
 0x259 PF: > { %p2152_p0 = scmp.ge.s32.totalorder %s2370_s22, 2  ;;  %s1654_s8 = sand.u32 1, %s2358_s20  }
 0x25a   : > { %p2788_p1 = scmp.ne.s32.totalorder %s2786_s30, 0  ;;  %s1655_s9 = scalar_lea.sflag [#allocation6], %s1654_s8 }
 0x25c   : > { %p2147_p2 = pnand %p2152_p0, %p2788_p1 }
 0x25e   : > { %p2148_p3 = pneg %p2147_p2 }
 0x260   : > { %2353 = dma.done.wait (%p2148_p3), %s1655_s9, 2048  }
 0x261   : > { %2355 = vsyncadd (%p2148_p3), %s1655_s9, 4294965248  ;;  %p21_p10 = scmp.ge.s32.totalorder %s2434_s25, 4   ;;  %s2789_s20 = smov %s2362_s21 }
 0x262   : > { %s2790_s21 = smov %s2366_s0  ;;  %s2791_s0 = smov %s2445_s28 }
 0x263   : > { %s2792_s22 = smov %s2434_s25  ;;  %23 = sbr.rel (!%p21_p10) target bundleno = 19 (0x13), region = 74 }
 0x268   :  { %1660 = vsyncpa [#allocation5], 1 }
 0x269   :  { %1662 = vsyncpa [#allocation5 + $0x1], 1 }
 0x26a   :  { %1663 = vsyncpa [#allocation6], 1 }
 0x26b   :  { %1665 = vsyncpa [#allocation6 + $0x1], 1 }

</bundles_post_ra>
